<compile_context>
chip_gen: v7x
topology: tpu7x:2x2x1
jax: 0.10.0
libtpu: 0.0.40
codegen_flags: <defaults>
</compile_context>

<pallas_src>
import jax
import jax.numpy as jnp
from jax.experimental import pallas as pl
from jax.experimental.pallas import tpu as pltpu

_LN_EPS = 1e-5


def _text_head_kernel(cls_raw_ref, gamma_ref, beta_ref, w_ref, b_ref,
                      logit_ref, cls_ref):
    """Fused TextModel head on a (TB, H) tile of raw CLS features:
         cls_output   = LayerNorm(cls_raw) * gamma + beta   (f32 VPU/XLU/EUP)
         intent_logit = cls_output @ W + b                  (bf16 MXU, f32 acc)
    """
    x = cls_raw_ref[...].astype(jnp.float32)                      # (TB, H)
    mu = jnp.mean(x, axis=-1, keepdims=True)                      # XLU reduce
    xc = x - mu
    var = jnp.mean(xc * xc, axis=-1, keepdims=True)               # biased var == torch LayerNorm
    xhat = xc * jax.lax.rsqrt(var + _LN_EPS)                      # EUP rsqrt; LN stays f32 (v5e: no bf16 VPU/EUP)
    cls = xhat * gamma_ref[...] + beta_ref[...]                   # affine LN (torch default elementwise_affine=True)
    cls_ref[...] = cls.astype(cls_ref.dtype)

    # Activations cast to bf16 for a single-pass MXU matmul with f32 accumulation.
    # TODO(synk): keep f32 activations (multi-pass MXU) if bit-level parity with a
    # torch f32 nn.Linear is required; memory-bound regime makes it nearly free.
    logits = jnp.dot(cls.astype(w_ref.dtype), w_ref[...],
                     preferred_element_type=jnp.float32)          # (TB, C) on MXU
    logit_ref[...] = (logits + b_ref[...]).astype(logit_ref.dtype)


def _batch_tiling(B):
    """Return (padded batch Bp, batch tile TB).

    - Small batches (<= 256 rows): one tile, pad only to the 8-row sublane
      multiple (dispatch overhead dominates; a multi-step grid only adds cost).
    - Large batches: 128-row-multiple tiles capped at 512 (keeps double-buffered
      in/out tiles inside v5e's 16 MiB default scoped VMEM at H<=1024) and >= 2
      grid steps so v7x's two TensorCores both get batch tiles.
    """
    Bp = ((B + 7) // 8) * 8
    if Bp <= 256:
        return Bp, Bp
    TB = min(512, max(128, (Bp // 2) // 128 * 128))
    Bp = ((Bp + TB - 1) // TB) * TB
    return Bp, TB


def text_head_pallas(cls_raw, gamma, beta, w, b, TB):
    """cls_raw: (Bp, H) f32 pre-LN CLS features (Bp % TB == 0),
       gamma/beta: (1, H) f32 LN affine, w: (H, C) bf16, b: (1, C) f32
       -> (intent_logit (Bp, C) f32, cls_output (Bp, H) f32)."""
    Bp, H = cls_raw.shape
    C = w.shape[1]
    grid = (Bp // TB,)

    cost = pl.CostEstimate(
        flops=2 * Bp * H * C,
        transcendentals=Bp,                                       # one rsqrt per row
        bytes_accessed=(H * C * w.dtype.itemsize                  # bf16 weight stream
                        + Bp * H * 4                              # cls features in
                        + Bp * C * 4 + Bp * H * 4                 # outputs
                        + 2 * H * 4 + C * 4),                     # gamma/beta/bias
    )

    # NOTE: w/b/gamma/beta use constant index_maps so the same VMEM tile is reused
    # across all batch tiles (no re-DMA).  If H/C grow to real RoBERTa sizes,
    # consider pipeline_mode=pl.Buffered(1) on those specs to drop their second
    # pipeline buffer; at H=256/C=384 (192 KiB) it is irrelevant.
    return pl.pallas_call(
        _text_head_kernel,
        out_shape=(
            jax.ShapeDtypeStruct((Bp, C), jnp.float32),
            jax.ShapeDtypeStruct((Bp, H), jnp.float32),           # f32 to match torch; bf16 here
        ),                                                        # would cut ~25% of HBM bytes
        grid=grid,
        in_specs=[
            pl.BlockSpec((TB, H), lambda i: (i, 0),
                         memory_space=pltpu.MemorySpace.VMEM),
            pl.BlockSpec((1, H), lambda i: (0, 0),
                         memory_space=pltpu.MemorySpace.VMEM),
            pl.BlockSpec((1, H), lambda i: (0, 0),
                         memory_space=pltpu.MemorySpace.VMEM),
            pl.BlockSpec((H, C), lambda i: (0, 0),
                         memory_space=pltpu.MemorySpace.VMEM),
            pl.BlockSpec((1, C), lambda i: (0, 0),
                         memory_space=pltpu.MemorySpace.VMEM),
        ],
        out_specs=(
            pl.BlockSpec((TB, C), lambda i: (i, 0),
                         memory_space=pltpu.MemorySpace.VMEM),
            pl.BlockSpec((TB, H), lambda i: (i, 0),
                         memory_space=pltpu.MemorySpace.VMEM),
        ),
        compiler_params=pltpu.CompilerParams(
            dimension_semantics=("parallel",)),                   # batch tiles shard across TCs (v7x)
        cost_estimate=cost,
    )(cls_raw, gamma, beta, w, b)


def make_params(key, vocab_size, hidden_size, num_class):
    k_emb, k_g, k_be, k_w, k_b = jax.random.split(key, 5)
    embed = jax.random.normal(k_emb, (vocab_size, hidden_size), jnp.float32) * 0.02
    # Stand-in encoder's final LayerNorm affine params (non-trivial so the test
    # actually exercises the fused affine path).
    ln_g = 1.0 + 0.02 * jax.random.normal(k_g, (1, hidden_size), jnp.float32)
    ln_b = 0.02 * jax.random.normal(k_be, (1, hidden_size), jnp.float32)
    # nn.Linear(hidden_size, num_class): weight (C, H), bias (C,).
    # Stored pre-transposed as (H, C) and cast to bf16 (native MXU path; f32 acc).
    w = (jax.random.normal(k_w, (hidden_size, num_class), jnp.float32) * 0.02
         ).astype(jnp.bfloat16)
    b = jax.random.normal(k_b, (1, num_class), jnp.float32) * 0.02
    return {"embed": embed, "ln_g": ln_g, "ln_b": ln_b, "w": w, "b": b}


def text_model_forward(texts, params):
    """Mirrors TextModel.forward(texts) -> (intent_logit, cls_output)."""
    tokens = jnp.squeeze(texts, axis=1)                           # texts.squeeze(1) -> (B, S)
    B = tokens.shape[0]
    Bp, TB = _batch_tiling(B)
    # TODO(synk): text_bert.extract_features is an external pretrained encoder
    # (fairseq RoBERTa); stand in with a token-local embedding lookup whose final
    # LayerNorm is fused into the Pallas head.  Since the stand-in is token-local
    # and the head only reads position 0, only the CLS token's embedding is
    # gathered -- no (B, S, H) tensor is materialized or DMA'd.
    cls_ids = jnp.pad(tokens[:, 0], (0, Bp - B))                  # pad the id vector, not the
    cls_raw = params["embed"][cls_ids]                            # (Bp, H) features (no extra copy)
    intent_logit, cls_output = text_head_pallas(
        cls_raw, params["ln_g"], params["ln_b"], params["w"], params["b"], TB)
    return intent_logit[:B], cls_output[:B]


def _reference_forward(texts, params):
    """Plain-JAX reference of the stubbed TextModel forward."""
    tokens = jnp.squeeze(texts, axis=1)
    x = params["embed"][tokens[:, 0]].astype(jnp.float32)
    mu = x.mean(-1, keepdims=True)
    var = ((x - mu) ** 2).mean(-1, keepdims=True)
    cls = (x - mu) / jnp.sqrt(var + _LN_EPS)
    cls = cls * params["ln_g"] + params["ln_b"]
    logit = cls @ params["w"].astype(jnp.float32) + params["b"]
    return logit, cls


if __name__ == "__main__":
    # Small shapes consistent with the module's forward:
    # texts: (B, 1, S) token ids; hidden_size -> 256; num_class -> 384.
    VOCAB, HIDDEN, NUM_CLASS = 50, 256, 384

    key = jax.random.PRNGKey(0)
    k_tok, k_tok2, k_par = jax.random.split(key, 3)
    params = make_params(k_par, VOCAB, HIDDEN, NUM_CLASS)

    # Fold squeeze/gather/slice into the same jit as the pallas_call so XLA can
    # fuse the (cheap) pre/post ops around the kernel.
    fwd = jax.jit(text_model_forward)

    # Case 1: tiny batch (single-tile grid; dispatch-bound regime).
    B, S = 2, 8
    texts = jax.random.randint(k_tok, (B, 1, S), 0, VOCAB, dtype=jnp.int32)
    intent_logit, cls_output = fwd(texts, params)
    jax.block_until_ready((intent_logit, cls_output))
    assert intent_logit.shape == (B, NUM_CLASS)
    assert cls_output.shape == (B, HIDDEN)
    logit_ref, cls_ref = _reference_forward(texts, params)
    assert jnp.allclose(cls_output, cls_ref, atol=1e-4), "cls mismatch (B=2)"
    assert jnp.allclose(intent_logit, logit_ref, atol=5e-3), "logit mismatch (B=2)"

    # Case 2: awkward batch size (300 -> padded to 384, TB=128, grid=(3,)) to
    # exercise the explicit multi-tile path that replaced the gcd tiling.
    B2 = 300
    texts2 = jax.random.randint(k_tok2, (B2, 1, S), 0, VOCAB, dtype=jnp.int32)
    intent_logit2, cls_output2 = fwd(texts2, params)
    jax.block_until_ready((intent_logit2, cls_output2))
    assert intent_logit2.shape == (B2, NUM_CLASS)
    assert cls_output2.shape == (B2, HIDDEN)
    logit_ref2, cls_ref2 = _reference_forward(texts2, params)
    assert jnp.allclose(cls_output2, cls_ref2, atol=1e-4), "cls mismatch (B=300)"
    assert jnp.allclose(intent_logit2, logit_ref2, atol=5e-3), "logit mismatch (B=300)"

    print("KERNEL_OK")
</pallas_src>

<mosaic_0001>
module attributes {stable_mosaic.version = 11 : i64} {
  func.func @_text_head_kernel(%arg0: i32, %arg1: memref<8x256xf32, #tpu.memory_space<vmem>>, %arg2: memref<1x256xf32, #tpu.memory_space<vmem>>, %arg3: memref<1x256xf32, #tpu.memory_space<vmem>>, %arg4: memref<256x384xbf16, #tpu.memory_space<vmem>>, %arg5: memref<1x384xf32, #tpu.memory_space<vmem>>, %arg6: memref<8x384xf32, #tpu.memory_space<vmem>>, %arg7: memref<8x256xf32, #tpu.memory_space<vmem>>) attributes {dimension_semantics = [#tpu.dimension_semantics<parallel>], iteration_bounds = array<i64: 1>, scalar_prefetch = 0 : i64, scratch_operands = 0 : i64, tpu.core_type = #tpu.core_type<tc>, window_params = [{transform_indices = @transform_0, window_bounds = array<i64: 8, 256>}, {pipeline_mode = #tpu.pipeline_mode<synchronous>, transform_indices = @transform_1, window_bounds = array<i64: 1, 256>}, {pipeline_mode = #tpu.pipeline_mode<synchronous>, transform_indices = @transform_2, window_bounds = array<i64: 1, 256>}, {pipeline_mode = #tpu.pipeline_mode<synchronous>, transform_indices = @transform_3, window_bounds = array<i64: 256, 384>}, {pipeline_mode = #tpu.pipeline_mode<synchronous>, transform_indices = @transform_4, window_bounds = array<i64: 1, 384>}, {transform_indices = @transform_5, window_bounds = array<i64: 8, 384>}, {transform_indices = @transform_6, window_bounds = array<i64: 8, 256>}]} {
    %c0 = arith.constant 0 : index
    %c0_0 = arith.constant 0 : index
    %0 = vector.load %arg1[%c0, %c0_0] : memref<8x256xf32, #tpu.memory_space<vmem>>, vector<8x256xf32>
    %cst = arith.constant dense<0.000000e+00> : vector<8xf32>
    %1 = vector.multi_reduction <add>, %0, %cst [1] : vector<8x256xf32> to vector<8xf32>
    %2 = vector.shape_cast %1 : vector<8xf32> to vector<8x1xf32>
    %cst_1 = arith.constant 2.560000e+02 : f32
    %3 = vector.broadcast %cst_1 : f32 to vector<8x1xf32>
    %4 = arith.divf %2, %3 : vector<8x1xf32>
    %5 = vector.broadcast %4 : vector<8x1xf32> to vector<8x256xf32>
    %6 = arith.subf %0, %5 : vector<8x256xf32>
    %7 = arith.mulf %6, %6 : vector<8x256xf32>
    %cst_2 = arith.constant dense<0.000000e+00> : vector<8xf32>
    %8 = vector.multi_reduction <add>, %7, %cst_2 [1] : vector<8x256xf32> to vector<8xf32>
    %9 = vector.shape_cast %8 : vector<8xf32> to vector<8x1xf32>
    %cst_3 = arith.constant 2.560000e+02 : f32
    %10 = vector.broadcast %cst_3 : f32 to vector<8x1xf32>
    %11 = arith.divf %9, %10 : vector<8x1xf32>
    %cst_4 = arith.constant 9.99999974E-6 : f32
    %12 = vector.broadcast %cst_4 : f32 to vector<8x1xf32>
    %13 = arith.addf %11, %12 : vector<8x1xf32>
    %14 = math.rsqrt %13 : vector<8x1xf32>
    %15 = vector.broadcast %14 : vector<8x1xf32> to vector<8x256xf32>
    %16 = arith.mulf %6, %15 : vector<8x256xf32>
    %c0_5 = arith.constant 0 : index
    %c0_6 = arith.constant 0 : index
    %17 = vector.load %arg2[%c0_5, %c0_6] : memref<1x256xf32, #tpu.memory_space<vmem>>, vector<1x256xf32>
    %18 = vector.broadcast %17 : vector<1x256xf32> to vector<8x256xf32>
    %19 = arith.mulf %16, %18 : vector<8x256xf32>
    %c0_7 = arith.constant 0 : index
    %c0_8 = arith.constant 0 : index
    %20 = vector.load %arg3[%c0_7, %c0_8] : memref<1x256xf32, #tpu.memory_space<vmem>>, vector<1x256xf32>
    %21 = vector.broadcast %20 : vector<1x256xf32> to vector<8x256xf32>
    %22 = arith.addf %19, %21 : vector<8x256xf32>
    %c0_9 = arith.constant 0 : index
    %c0_10 = arith.constant 0 : index
    %23 = vector.load %arg7[%c0_9, %c0_10] : memref<8x256xf32, #tpu.memory_space<vmem>>, vector<8x256xf32>
    tpu.vector_store %arg7[%c0_9, %c0_10], %22 {strides = array<i32>} : memref<8x256xf32, #tpu.memory_space<vmem>>, vector<8x256xf32>,
    %24 = arith.truncf %22 : vector<8x256xf32> to vector<8x256xbf16>
    %c0_11 = arith.constant 0 : index
    %c0_12 = arith.constant 0 : index
    %25 = vector.load %arg4[%c0_11, %c0_12] : memref<256x384xbf16, #tpu.memory_space<vmem>>, vector<256x384xbf16>
    %cst_13 = arith.constant dense<0.000000e+00> : vector<8x384xf32>
    %26 = tpu.matmul %24, %25, %cst_13 {dimension_numbers = #tpu.dot_dimension_numbers<[1], [0], [0], [1], [0, 0, 1, 1], [], []>} : vector<8x256xbf16>, vector<256x384xbf16>, vector<8x384xf32> -> vector<8x384xf32>
    %c0_14 = arith.constant 0 : index
    %c0_15 = arith.constant 0 : index
    %27 = vector.load %arg5[%c0_14, %c0_15] : memref<1x384xf32, #tpu.memory_space<vmem>>, vector<1x384xf32>
    %28 = vector.broadcast %27 : vector<1x384xf32> to vector<8x384xf32>
    %29 = arith.addf %26, %28 : vector<8x384xf32>
    %c0_16 = arith.constant 0 : index
    %c0_17 = arith.constant 0 : index
    %30 = vector.load %arg6[%c0_16, %c0_17] : memref<8x384xf32, #tpu.memory_space<vmem>>, vector<8x384xf32>
    tpu.vector_store %arg6[%c0_16, %c0_17], %29 {strides = array<i32>} : memref<8x384xf32, #tpu.memory_space<vmem>>, vector<8x384xf32>,
    return
  }
  func.func @transform_0(%arg0: i32) -> (i32, i32) {
    %c0_i32 = arith.constant 0 : i32
    %c0_i32_0 = arith.constant 0 : i32
    return %arg0, %c0_i32 : i32, i32
  }
  func.func @transform_1(%arg0: i32) -> (i32, i32) {
    %c0_i32 = arith.constant 0 : i32
    %c0_i32_0 = arith.constant 0 : i32
    %c0_i32_1 = arith.constant 0 : i32
    return %c0_i32, %c0_i32_0 : i32, i32
  }
  func.func @transform_2(%arg0: i32) -> (i32, i32) {
    %c0_i32 = arith.constant 0 : i32
    %c0_i32_0 = arith.constant 0 : i32
    %c0_i32_1 = arith.constant 0 : i32
    return %c0_i32, %c0_i32_0 : i32, i32
  }
  func.func @transform_3(%arg0: i32) -> (i32, i32) {
    %c0_i32 = arith.constant 0 : i32
    %c0_i32_0 = arith.constant 0 : i32
    %c0_i32_1 = arith.constant 0 : i32
    return %c0_i32, %c0_i32_0 : i32, i32
  }
  func.func @transform_4(%arg0: i32) -> (i32, i32) {
    %c0_i32 = arith.constant 0 : i32
    %c0_i32_0 = arith.constant 0 : i32
    %c0_i32_1 = arith.constant 0 : i32
    return %c0_i32, %c0_i32_0 : i32, i32
  }
  func.func @transform_5(%arg0: i32) -> (i32, i32) {
    %c0_i32 = arith.constant 0 : i32
    %c0_i32_0 = arith.constant 0 : i32
    return %arg0, %c0_i32 : i32, i32
  }
  func.func @transform_6(%arg0: i32) -> (i32, i32) {
    %c0_i32 = arith.constant 0 : i32
    %c0_i32_0 = arith.constant 0 : i32
    return %arg0, %c0_i32 : i32, i32
  }
}

</mosaic_0001>

<bundles_post_ra>
// kernel: text_model_forward.1
= control target key start
LH: loop header
LB: loop body
LE: loop exit
PB: predicated region body
PF: predicated region fallthrough
CT: control target
= control target key end

     0   :  { %12 = vsyncpa [#allocation3], 0  ;;  %s681_s21 = smov [#allocation2]   ;;  %s771_s0 = inlined_call_operand.vmem [shape: f32[8,256], index: 0, kind: input, shape index: {}]   ;;  %s772_s1 = inlined_call_operand.vmem [shape: f32[1,256], index: 1, kind: input, shape index: {}]   ;;  %s773_s2 = inlined_call_operand.vmem [shape: f32[1,256], index: 2, kind: input, shape index: {}]   ;;  %s774_s3 = inlined_call_operand.hbm [shape: bf16[256,384], index: 3, kind: input, shape index: {}]   ;;  %s775_s4 = inlined_call_operand.vmem [shape: f32[1,384], index: 4, kind: input, shape index: {}]   ;;  %s776_s5 = inlined_call_operand.vmem [shape: f32[8,384], index: 5, kind: output, shape index: {0}]   ;;  %s777_s6 = inlined_call_operand.vmem [shape: f32[8,256], index: 6, kind: output, shape index: {1}]  }
   0x1   :  { %s24_s22 = sshll.u32 %s681_s21, 4  ;;  %s657_s25 = scalar_lea.hbm %s774_s3, 6144  ;;  %s25_s22 = int_to_ptr.vmem [resolvable:$true] %s24_s22 }
   0x2   :  { %p658_p0 = scmp.ne.s32.totalorder %s774_s3, %s657_s25  ;;  %p661_p1 = scmp.lt.u32.totalorder %s657_s25, %s774_s3 }
   0x4   :  { %p663_p2 = pnand %p661_p1, %p658_p0 }
   0x6   :  { %666 = shalt.err (!%p663_p2)
}
   0x7   :  { %s667_s30 = scalar_lea.vmem %s25_s22, 6144  ;;  %p672_p4 = scmp.lt.s32.totalorder %s25_s22, %s25_s22 }
   0x8   :  { %p668_p3 = scmp.ne.s32.totalorder %s25_s22, %s667_s30  ;;  %p673_p5 = scmp.lt.s32.totalorder %s667_s30, %s667_s30 }
   0xa   :  { %p674_p6 = por %p673_p5, %p672_p4 }
   0xc   :  { %p675_p7 = pnand %p674_p6, %p668_p3 }
   0xe   :  { %678 = shalt.err (!%p675_p7)
}
   0xf   :  { %s682_s7 = smov 192   ;;  %s683_s8 = smov 12  }
  0x10   :  { %30 = dma.hbm_to_vmem [thread:$0]  %s774_s3, 6144, %s25_s22, [#allocation3], %s682_s7, %s682_s7, %s683_s8  }
  0x11   :  { %679 = dma.done.wait [#allocation3], 6144  }
  0x12   :  { %680 = vsyncadd [#allocation3], 4294961152  ;;  %v37_v0 = vld [vmem:[%s771_s0] sm:$0xff]  ;;  %v38_v1 = vld [vmem:[%s771_s0 + $0x8] sm:$0xff]  ;;  %v58_v60 = vlaneseq }
  0x13   :  { %v39_v2 = vadd.f32 %v38_v1, %v37_v0  ;;  %v591_v3 = vld [vmem:[#allocation2 + $0x4] ss:$12 sps:$4 sm:$0xff]   ;;  %v593_v4 = vld [vmem:[#allocation2] ss:$12 sps:$4 sm:$0xff]   ;;  %v594_v5 = vld [vmem:[#allocation2 + $0x1c] ss:$12 sps:$4 sm:$0xff]  }
  0x14   :  { %425 = vmatprep.subr.bf16.mxu0 %v591_v3  ;;  %v596_v6 = vld [vmem:[#allocation2 + $0x18] ss:$12 sps:$4 sm:$0xff]   ;;  %v597_v7 = vld [vmem:[#allocation2 + $0x34] ss:$12 sps:$4 sm:$0xff]   ;;  %v599_v10 = vld [vmem:[#allocation2 + $0x30] ss:$12 sps:$4 sm:$0xff]  }
  0x15   :  { %40 = vadd.xlane.f32.xlu0 %v39_v2  ;;  %426 = vmatpush1.bf16.msra.mxu0 %v593_v4  ;;  %v617_v8 = vld [vmem:[#allocation2 + $0xc8] ss:$12 sps:$4 sm:$0xff]   ;;  %v622_v11 = vld [vmem:[#allocation2 + $0xe0] ss:$12 sps:$4 sm:$0xff]   ;;  %v603_v15 = vld [vmem:[#allocation2 + $0x64] ss:$12 sps:$4 sm:$0xff]  }
  0x16   :  { %427 = vmatprep.subr.bf16.mxu0 %v594_v5  ;;  %v619_v9 = vld [vmem:[#allocation2 + $0x8] ss:$12 sps:$4 sm:$0xff]   ;;  %566 = vmatprep.subr.bf16.mxu1 %v617_v8  ;;  %v600_v12 = vld [vmem:[#allocation2 + $0x4c] ss:$12 sps:$4 sm:$0xff]   ;;  %v611_v20 = vld [vmem:[#allocation2 + $0x90] ss:$12 sps:$4 sm:$0xff]  }
  0x17   :  { %567 = vmatpush3.bf16.msra.mxu1 %v619_v9  ;;  %v624_v13 = vld [vmem:[#allocation2 + $0x20] ss:$12 sps:$4 sm:$0xff]   ;;  %v602_v14 = vld [vmem:[#allocation2 + $0x48] ss:$12 sps:$4 sm:$0xff]   ;;  %v608_v18 = vld [vmem:[#allocation2 + $0x78] ss:$12 sps:$4 sm:$0xff]  }
  0x18   :  { %568 = vmatprep.subr.bf16.mxu1 %v622_v11  ;;  %v605_v16 = vld [vmem:[#allocation2 + $0x60] ss:$12 sps:$4 sm:$0xff]   ;;  %v606_v17 = vld [vmem:[#allocation2 + $0x7c] ss:$12 sps:$4 sm:$0xff]   ;;  %v615_v23 = vld [vmem:[#allocation2 + $0xc4] ss:$12 sps:$4 sm:$0xff]  }
  0x19   :  { %428 = vmatpush1.bf16.msra.mxu0 %v596_v6  ;;  %v609_v19 = vld [vmem:[#allocation2 + $0x94] ss:$12 sps:$4 sm:$0xff]   ;;  %v612_v21 = vld [vmem:[#allocation2 + $0xac] ss:$12 sps:$4 sm:$0xff]   ;;  %v620_v25 = vld [vmem:[#allocation2 + $0xdc] ss:$12 sps:$4 sm:$0xff]  }
  0x1a   :  { %429 = vmatprep.subr.bf16.mxu0 %v597_v7  ;;  %v614_v22 = vld [vmem:[#allocation2 + $0xa8] ss:$12 sps:$4 sm:$0xff]   ;;  %v618_v24 = vld [vmem:[#allocation2 + $0xc0] ss:$12 sps:$4 sm:$0xff]   ;;  %v623_v26 = vld [vmem:[#allocation2 + $0xd8] ss:$12 sps:$4 sm:$0xff]  }
  0x1b   :  { %569 = vmatpush3.bf16.msra.mxu1 %v624_v13  ;;  %v625_v34 = vld [vmem:[#allocation2 + $0xf4] ss:$12 sps:$4 sm:$0xff]   ;;  %v627_v35 = vld [vmem:[#allocation2 + $0xf8] ss:$12 sps:$4 sm:$0xff]   ;;  %v628_v36 = vld [vmem:[#allocation2 + $0xf0] ss:$12 sps:$4 sm:$0xff]  }
  0x1c   :  { %v629_v37 = vld [vmem:[#allocation2 + $0x38] ss:$12 sps:$4 sm:$0xff]   ;;  %570 = vmatprep.subr.bf16.mxu1 %v627_v35  ;;  %v632_v39 = vld [vmem:[#allocation2 + $0x110] ss:$12 sps:$4 sm:$0xff]   ;;  %v633_v40 = vld [vmem:[#allocation2 + $0x108] ss:$12 sps:$4 sm:$0xff]  }
  0x1d   :  { %430 = vmatpush1.bf16.msra.mxu0 %v599_v10  ;;  %v630_v38 = vld [vmem:[#allocation2 + $0x10c] ss:$12 sps:$4 sm:$0xff]   ;;  %v634_v41 = vld [vmem:[#allocation2 + $0x50] ss:$12 sps:$4 sm:$0xff]   ;;  %v637_v43 = vld [vmem:[#allocation2 + $0x128] ss:$12 sps:$4 sm:$0xff]  }
  0x1e   :  { %431 = vmatprep.subr.bf16.mxu0 %v600_v12  ;;  %v635_v42 = vld [vmem:[#allocation2 + $0x124] ss:$12 sps:$4 sm:$0xff]   ;;  %v638_v44 = vld [vmem:[#allocation2 + $0x120] ss:$12 sps:$4 sm:$0xff]   ;;  %v639_v45 = vld [vmem:[#allocation2 + $0x68] ss:$12 sps:$4 sm:$0xff]  }
  0x1f   :  { %571 = vmatpush3.bf16.msra.mxu1 %v629_v37  ;;  %v640_v46 = vld [vmem:[#allocation2 + $0x13c] ss:$12 sps:$4 sm:$0xff]   ;;  %v642_v47 = vld [vmem:[#allocation2 + $0x140] ss:$12 sps:$4 sm:$0xff]   ;;  %v643_v48 = vld [vmem:[#allocation2 + $0x138] ss:$12 sps:$4 sm:$0xff]  }
  0x20   :  { %572 = vmatprep.subr.bf16.mxu1 %v632_v39  ;;  %v644_v49 = vld [vmem:[#allocation2 + $0x80] ss:$12 sps:$4 sm:$0xff]   ;;  %v647_v51 = vld [vmem:[#allocation2 + $0x158] ss:$12 sps:$4 sm:$0xff]   ;;  %v648_v52 = vld [vmem:[#allocation2 + $0x150] ss:$12 sps:$4 sm:$0xff]  }
  0x21   :  { %432 = vmatpush1.bf16.msra.mxu0 %v602_v14  ;;  %v645_v50 = vld [vmem:[#allocation2 + $0x154] ss:$12 sps:$4 sm:$0xff]   ;;  %v649_v53 = vld [vmem:[#allocation2 + $0x98] ss:$12 sps:$4 sm:$0xff]   ;;  %v652_v55 = vld [vmem:[#allocation2 + $0x170] ss:$12 sps:$4 sm:$0xff]  }
  0x22   :  { %433 = vmatprep.subr.bf16.mxu0 %v603_v15  ;;  %v650_v54 = vld [vmem:[#allocation2 + $0x16c] ss:$12 sps:$4 sm:$0xff]   ;;  %v653_v56 = vld [vmem:[#allocation2 + $0x168] ss:$12 sps:$4 sm:$0xff]   ;;  %v654_v57 = vld [vmem:[#allocation2 + $0xb0] ss:$12 sps:$4 sm:$0xff]  }
  0x23   :  { %573 = vmatpush3.bf16.msra.mxu1 %v634_v41  ;;  %v59_v62 = vshrl.u32 %v58_v60, 7  ;;  %v70_v2 = vld [vmem:[%s773_s2] sm:$0x3] }
  0x24   :  { %574 = vmatprep.subr.bf16.mxu1 %v637_v43 }
  0x25   :  { %434 = vmatpush1.bf16.msra.mxu0 %v605_v16  ;;  %v60_v63 = vsub.s32 0, %v59_v62  ;;  %v152_v16 = vld [vmem:[%s775_s4] sm:$0x7] }
  0x26   :  { %435 = vmatprep.subr.bf16.mxu0 %v606_v17  ;;  %v164_v17 = vsub.s32 2, %v59_v62 }
  0x27   :  { %575 = vmatpush3.bf16.msra.mxu1 %v639_v45  ;;  %v75_v7 = vrot.slane %v70_v2, %v60_v63 }
  0x28   :  { %576 = vmatprep.subr.bf16.mxu1 %v642_v47 }
  0x29   :  { %436 = vmatpush1.bf16.msra.mxu0 %v608_v18  ;;  %v157_v18 = vrot.slane %v152_v16, %v60_v63 }
  0x2a   :  { %437 = vmatprep.subr.bf16.mxu0 %v609_v19 }
  0x2b   :  { %577 = vmatpush3.bf16.msra.mxu1 %v644_v49 }
  0x2c   :  { %578 = vmatprep.subr.bf16.mxu1 %v647_v51 }
  0x2d   :  { %438 = vmatpush1.bf16.msra.mxu0 %v611_v20 }
  0x2e   :  { %439 = vmatprep.subr.bf16.mxu0 %v612_v21 }
  0x2f   :  { %579 = vmatpush3.bf16.msra.mxu1 %v649_v53 }
  0x30   :  { %580 = vmatprep.subr.bf16.mxu1 %v652_v55 }
  0x31   :  { %440 = vmatpush1.bf16.msra.mxu0 %v614_v22  ;;  %v165_v22 = vrot.slane %v152_v16, %v164_v17 }
  0x32   :  { %441 = vmatprep.subr.bf16.mxu0 %v615_v23 }
  0x33   :  { %581 = vmatpush3.bf16.msra.mxu1 %v654_v57 }
  0x35   :  { %442 = vmatpush1.bf16.msra.mxu0 %v618_v24 }
  0x36   :  { %443 = vmatprep.subr.bf16.mxu0 %v620_v25 }
  0x39   :  { %444 = vmatpush1.bf16.msra.mxu0 %v623_v26 }
  0x3a   :  { %445 = vmatprep.subr.bf16.mxu0 %v625_v34 }
  0x3d   :  { %446 = vmatpush1.bf16.msra.mxu0 %v628_v36 }
  0x3e   :  { %447 = vmatprep.subr.bf16.mxu0 %v630_v38 }
  0x41   :  { %448 = vmatpush1.bf16.msra.mxu0 %v633_v40 }
  0x42   :  { %449 = vmatprep.subr.bf16.mxu0 %v635_v42 }
  0x45   :  { %450 = vmatpush1.bf16.msra.mxu0 %v638_v44 }
  0x46   :  { %451 = vmatprep.subr.bf16.mxu0 %v640_v46 }
  0x49   :  { %452 = vmatpush1.bf16.msra.mxu0 %v643_v48 }
  0x4a   :  { %453 = vmatprep.subr.bf16.mxu0 %v645_v50 }
  0x4d   :  { %454 = vmatpush1.bf16.msra.mxu0 %v648_v52 }
  0x4e   :  { %455 = vmatprep.subr.bf16.mxu0 %v650_v54 }
  0x51   :  { %456 = vmatpush1.bf16.msra.mxu0 %v653_v56 }
  0xa2   :  { %v41_v27 = vpop.xlane.xlu0 %40 }
  0xa3   :  { %v43_v28 = vmul.f32 0.00390625, %v41_v27 }
  0xa5   :  { %v737_v29 = vsub.f32 %v37_v0, %v43_v28  ;;  %v739_v30 = vsub.f32 %v38_v1, %v43_v28  ;;  %v64_v0 = vsub.s32 1, %v59_v62  ;;  %v56_v1 = vld [vmem:[%s772_s1] sm:$0x3] }
  0xa6   :  { %v61_v3 = vrot.slane %v56_v1, %v60_v63 }
  0xa7   :  { %v46_v31 = vmul.f32 %v737_v29, %v737_v29  ;;  %v47_v32 = vmul.f32 %v739_v30, %v739_v30  ;;  %v65_v4 = vrot.slane %v56_v1, %v64_v0  ;;  %v79_v8 = vrot.slane %v70_v2, %v64_v0 }
  0xa8   :  { %v161_v19 = vrot.slane %v152_v16, %v64_v0 }
  0xa9   :  { %v48_v33 = vadd.f32 %v47_v32, %v46_v31 }
  0xab   :  { %49 = vadd.xlane.f32.xlu0 %v48_v33 }
 0x138   :  { %v50_v58 = vpop.xlane.xlu0 %49 }
 0x139   :  { %v51_v59 = vmul.f32 0.00390625, %v50_v58 }
 0x13b   :  { %v52_v61 = vadd.f32 1e-05, %v51_v59 }
 0x13d   :  { %655 = vrsqrt.f32 %v52_v61 }
 0x147   :  { %v656_v5 = vpop.eup %655 }
 0x148   :  { %v55_v6 = vmul.f32 %v656_v5, %v739_v30  ;;  %v54_v9 = vmul.f32 %v656_v5, %v737_v29 }
 0x14a   :  { %v69_v10 = vmul.f32 %v65_v4, %v55_v6  ;;  %v68_v11 = vmul.f32 %v61_v3, %v54_v9 }
 0x14c   :  { %v83_v12 = vadd.f32 %v79_v8, %v69_v10  ;;  %v82_v13 = vadd.f32 %v75_v7, %v68_v11 }
 0x14e   :  { %85 = vst [vmem:[%s777_s6 + $0x8] sm:$0xff] %v83_v12  ;;  %v87_v14 = vpack.c.bf16 %v83_v12, %v83_v12  ;;  %84 = vst [vmem:[%s777_s6] sm:$0xff] %v82_v13  ;;  %v86_v15 = vpack.c.bf16 %v82_v13, %v82_v13 }
 0x150   :  { %457 = vmatprep.mubr.bf16.mxu0 %v87_v14  ;;  %498 = vmatprep.mubr.bf16.mxu1 %v87_v14 }
 0x151   :  { %458 = vmatmul.mubr.bf16.vlgmr.msra.gmra.mrb[0].mxu0 %v86_v15  ;;  %499 = vmatmul.mubr.bf16.vlgmr.msra.gmra.mrb[0].mxu1 %v86_v15 }
 0x224   :  { %v459_v20 = vpop.f32.mrb[0].mxu0  ;;  %v582_v21 = vpop.f32.mrb[0].mxu1 }
 0x225   :  { %v460_v23 = vadd.f32 %v459_v20, %v157_v18  ;;  %v461_v24 = vpop.f32.mrb[1].mxu0  ;;  %v583_v25 = vpop.f32.mrb[1].mxu1 }
 0x226   :  { %v462_v26 = vadd.f32 %v461_v24, %v161_v19  ;;  %v584_v27 = vadd.f32 %v583_v25, %v582_v21  ;;  %v463_v28 = vpop.f32.mrb[2].mxu0  ;;  %v585_v29 = vpop.f32.mrb[2].mxu1 }
 0x227   :  { %506 = vst [vmem:[%s776_s5] sm:$0xff] %v460_v23  ;;  %v464_v30 = vpop.f32.mrb[3].mxu0  ;;  %v586_v31 = vpop.f32.mrb[3].mxu1 }
 0x228   :  { %507 = vst [vmem:[%s776_s5 + $0x8] sm:$0xff] %v462_v26  ;;  %v501_v32 = vadd.f32 %v584_v27, %v165_v22 }
 0x22a   :  { %508 = vst [vmem:[%s776_s5 + $0x10] sm:$0xff] %v501_v32 }
 0x22b   :  { %517 = vsyncpa [#allocation3], 1 }

</bundles_post_ra>
